<compile_context>
chip_gen: v7x
topology: tpu7x:2x2x1
jax: 0.10.0
libtpu: 0.0.40
codegen_flags: <defaults>
</compile_context>

<pallas_src>
import functools

import jax
import jax.numpy as jnp
from jax.experimental import pallas as pl
from jax.experimental.pallas import tpu as pltpu


def _head_kernel(x_ref, w1_ref, b1_ref, w2_ref, b2_ref, out_ref, *,
                 num_class, n_vad):
    """Fused classifier head: dense1 + tanh, then fused (dense21|dense22)
    with sigmoid applied only to the VAD lanes.  x_ref arrives already in the
    MXU compute dtype as contiguous (row_tile, H) CLS rows."""
    # dense1: bf16 MXU inputs, f32 accumulation; bias add + tanh in f32
    # (v5e has no bf16 VPU/EUP path).
    h = jnp.dot(x_ref[...], w1_ref[...],
                preferred_element_type=jnp.float32) + b1_ref[...]
    h = jnp.tanh(h)

    # Fused dense21|dense22: one lane-dense (row_tile, 128) matmul and a
    # single unmasked 128-lane store.
    z = jnp.dot(h.astype(w2_ref.dtype), w2_ref[...],
                preferred_element_type=jnp.float32) + b2_ref[...]

    # sigmoid only on VAD lanes [num_class, num_class + n_vad); class-logit
    # lanes pass through unchanged.
    lane = jax.lax.broadcasted_iota(jnp.int32, z.shape, 1)
    vad_lane = (lane >= num_class) & (lane < num_class + n_vad)
    out_ref[...] = jnp.where(vad_lane, jax.nn.sigmoid(z), z).astype(out_ref.dtype)


def prepare_params(params, num_class, *, compute_dtype=jnp.bfloat16):
    """One-time parameter preparation (call once at model-load time, NOT per
    forward): fuse dense21|dense22 into a single 128-lane-padded projection
    and cast the matmul weights to the MXU compute dtype."""
    w1, b1, w21, b21, w22, b22 = params
    H = w1.shape[0]
    n_vad = w22.shape[1]
    out_pad = max(128, 128 * pl.cdiv(num_class + n_vad, 128))

    w2 = (jnp.zeros((H, out_pad), jnp.float32)
          .at[:, :num_class].set(w21)
          .at[:, num_class:num_class + n_vad].set(w22))
    b2 = (jnp.zeros((1, out_pad), jnp.float32)
          .at[:, :num_class].set(jnp.reshape(b21, (1, -1)))
          .at[:, num_class:num_class + n_vad].set(jnp.reshape(b22, (1, -1))))

    return dict(
        w1=jnp.asarray(w1, compute_dtype),
        b1=jnp.asarray(b1, jnp.float32).reshape(1, H),
        w2=w2.astype(compute_dtype),
        b2=b2,
        hidden=int(H),
        num_class=int(num_class),
        n_vad=int(n_vad),
        out_pad=int(out_pad),
        compute_dtype=compute_dtype,
    )


def _choose_row_tile(batch):
    """Adaptive row tiling: a single step for tiny batches, >=2 steps (so the
    'parallel' batch axis shards across v7x's two TensorCores) for B >= 16,
    capped at 512 rows to amortize per-grid-step overhead while keeping the
    VMEM footprint small."""
    rows = 8 * pl.cdiv(max(int(batch), 1), 8)   # sublane (8) alignment
    if rows < 16:
        return rows
    half = 8 * pl.cdiv(pl.cdiv(rows, 2), 8)
    return min(half, 512)


def vad_roberta_head(x, prepared, *, row_tile=None):
    """x: (B, S, H) RoBERTa hidden states.  Returns (class_logits, vad_scores)."""
    B, S, H = x.shape
    assert H == prepared["hidden"]
    num_class = prepared["num_class"]
    n_vad = prepared["n_vad"]
    out_pad = prepared["out_pad"]
    compute_dtype = prepared["compute_dtype"]

    # CLS selection + compute-dtype cast in the wrapper: touches only B*H
    # elements (never the full (B, S, H) tensor) and hands the kernel a
    # contiguous, half-width input, so no in-kernel cast is needed.
    cls = x[:, 0, :].astype(compute_dtype)

    if row_tile is None:
        row_tile = _choose_row_tile(B)
    n_steps = pl.cdiv(B, row_tile)
    rows = n_steps * row_tile
    if rows != B:
        cls = jnp.pad(cls, ((0, rows - B), (0, 0)))   # pads only the tiny (B, H) slice

    w1, b1, w2, b2 = prepared["w1"], prepared["b1"], prepared["w2"], prepared["b2"]
    kernel = functools.partial(_head_kernel, num_class=num_class, n_vad=n_vad)

    cdt = jnp.dtype(compute_dtype).itemsize
    # Explicit scoped-VMEM budget: double-buffered x/out blocks, resident
    # weights (worst case double-buffered), f32 intermediates, plus headroom.
    vmem_needed = (
        2 * row_tile * H * cdt                       # x block, double-buffered
        + 2 * row_tile * out_pad * 4                 # out block, double-buffered
        + 2 * (H * H + H * out_pad) * cdt            # weights
        + 2 * (H + out_pad) * 4                      # biases
        + row_tile * (H + out_pad) * 4               # h / z f32 intermediates
        + (4 << 20)                                  # headroom
    )
    vmem_limit = int(min(max(vmem_needed, 32 << 20), 64 << 20))

    cost = pl.CostEstimate(
        flops=2 * rows * H * (H + out_pad),
        transcendentals=rows * (H + out_pad),
        bytes_accessed=(rows * H * cdt + (H * H + H * out_pad) * cdt
                        + (H + out_pad) * 4 + rows * out_pad * 4),
    )

    def build_and_run(single_buffer_weights):
        if single_buffer_weights:
            def wspec(shape):
                return pl.BlockSpec(shape, lambda i: (0,) * len(shape),
                                    pipeline_mode=pl.Buffered(1))
        else:
            def wspec(shape):
                return pl.BlockSpec(shape, lambda i: (0,) * len(shape))

        return pl.pallas_call(
            kernel,
            out_shape=jax.ShapeDtypeStruct((rows, out_pad), jnp.float32),
            grid_spec=pltpu.PrefetchScalarGridSpec(
                num_scalar_prefetch=0,
                grid=(n_steps,),
                in_specs=[
                    # CLS rows: (row_tile, H) contiguous bf16 window.
                    pl.BlockSpec((row_tile, H), lambda i: (i, 0)),
                    # Weights/biases: constant index_maps -> VMEM-resident.
                    wspec((H, H)),
                    wspec((1, H)),
                    wspec((H, out_pad)),
                    wspec((1, out_pad)),
                ],
                out_specs=pl.BlockSpec((row_tile, out_pad), lambda i: (i, 0)),
            ),
            compiler_params=pltpu.CompilerParams(
                dimension_semantics=("parallel",),
                vmem_limit_bytes=vmem_limit),
            cost_estimate=cost,
        )(cls, w1, b1, w2, b2)

    try:
        out = build_and_run(True)
    except Exception:
        # pipeline_mode=pl.Buffered(1) not supported on this jax/Mosaic
        # version; fall back to default double-buffering (same semantics,
        # slightly more VMEM for the resident weights).
        out = build_and_run(False)

    return out[:B, :num_class], out[:B, num_class:num_class + n_vad]


def init_params(key, hidden_size, num_class):
    """Deterministic init mimicking nn.Linear (uniform(-1/sqrt(in), 1/sqrt(in))).
    Weights are stored pre-transposed as (in_features, out_features)."""
    ks = jax.random.split(key, 6)

    def linear(kw, kb, fan_in, fan_out):
        bound = 1.0 / jnp.sqrt(fan_in)
        w = jax.random.uniform(kw, (fan_in, fan_out), jnp.float32, -bound, bound)
        b = jax.random.uniform(kb, (1, fan_out), jnp.float32, -bound, bound)
        return w, b

    w1, b1 = linear(ks[0], ks[1], hidden_size, hidden_size)      # dense1
    w21, b21 = linear(ks[2], ks[3], hidden_size, num_class)      # dense21
    w22, b22 = linear(ks[4], ks[5], hidden_size, 3)              # dense22
    return (w1, b1, w21, b21, w22, b22)


if __name__ == "__main__":
    B, S, H, NUM_CLASS = 8, 8, 128, 8

    key = jax.random.PRNGKey(0)
    k_x, k_p = jax.random.split(key)

    # Stand-in for the RoBERTa encoder output (B, S, H).
    x = jax.random.normal(k_x, (B, S, H), jnp.float32)
    params = init_params(k_p, H, NUM_CLASS)

    prepared = prepare_params(params, NUM_CLASS)          # one-time param prep
    cls_logits, vad_scores = vad_roberta_head(x, prepared)
    jax.block_until_ready((cls_logits, vad_scores))

    # sanity check against a plain-JAX reference mirroring the kernel's
    # bf16-MXU / f32-accumulate mixed precision.
    w1, b1, w21, b21, w22, b22 = params
    to_bf = lambda a: a.astype(jnp.bfloat16).astype(jnp.float32)
    xc = to_bf(x[:, 0, :])
    h_ref = jnp.tanh(xc @ to_bf(w1) + b1)
    h_bf = to_bf(h_ref)
    ref_cls = h_bf @ to_bf(w21) + b21
    ref_vad = jax.nn.sigmoid(h_bf @ to_bf(w22) + b22)

    assert cls_logits.shape == (B, NUM_CLASS)
    assert vad_scores.shape == (B, 3)
    assert jnp.allclose(cls_logits, ref_cls, atol=2e-2), float(jnp.max(jnp.abs(cls_logits - ref_cls)))
    assert jnp.allclose(vad_scores, ref_vad, atol=2e-2), float(jnp.max(jnp.abs(vad_scores - ref_vad)))

    print("KERNEL_OK")
</pallas_src>

<mosaic_0001>
module attributes {stable_mosaic.version = 11 : i64} {
  func.func @_head_kernel(%arg0: i32, %arg1: memref<8x128xbf16, #tpu.memory_space<vmem>>, %arg2: memref<128x128xbf16, #tpu.memory_space<vmem>>, %arg3: memref<1x128xf32, #tpu.memory_space<vmem>>, %arg4: memref<128x128xbf16, #tpu.memory_space<vmem>>, %arg5: memref<1x128xf32, #tpu.memory_space<vmem>>, %arg6: memref<8x128xf32, #tpu.memory_space<vmem>>) attributes {dimension_semantics = [#tpu.dimension_semantics<parallel>], iteration_bounds = array<i64: 1>, scalar_prefetch = 0 : i64, scratch_operands = 0 : i64, tpu.core_type = #tpu.core_type<tc>, window_params = [{transform_indices = @transform_0, window_bounds = array<i64: 8, 128>}, {pipeline_mode = #tpu.pipeline_mode<synchronous>, transform_indices = @transform_1, window_bounds = array<i64: 128, 128>}, {pipeline_mode = #tpu.pipeline_mode<synchronous>, transform_indices = @transform_2, window_bounds = array<i64: 1, 128>}, {pipeline_mode = #tpu.pipeline_mode<synchronous>, transform_indices = @transform_3, window_bounds = array<i64: 128, 128>}, {pipeline_mode = #tpu.pipeline_mode<synchronous>, transform_indices = @transform_4, window_bounds = array<i64: 1, 128>}, {transform_indices = @transform_5, window_bounds = array<i64: 8, 128>}]} {
    %c0 = arith.constant 0 : index
    %c0_0 = arith.constant 0 : index
    %0 = vector.load %arg1[%c0, %c0_0] : memref<8x128xbf16, #tpu.memory_space<vmem>>, vector<8x128xbf16>
    %c0_1 = arith.constant 0 : index
    %c0_2 = arith.constant 0 : index
    %1 = vector.load %arg2[%c0_1, %c0_2] : memref<128x128xbf16, #tpu.memory_space<vmem>>, vector<128x128xbf16>
    %cst = arith.constant dense<0.000000e+00> : vector<8x128xf32>
    %2 = tpu.matmul %0, %1, %cst {dimension_numbers = #tpu.dot_dimension_numbers<[1], [0], [0], [1], [0, 0, 1, 1], [], []>} : vector<8x128xbf16>, vector<128x128xbf16>, vector<8x128xf32> -> vector<8x128xf32>
    %c0_3 = arith.constant 0 : index
    %c0_4 = arith.constant 0 : index
    %3 = vector.load %arg3[%c0_3, %c0_4] : memref<1x128xf32, #tpu.memory_space<vmem>>, vector<1x128xf32>
    %4 = vector.broadcast %3 : vector<1x128xf32> to vector<8x128xf32>
    %5 = arith.addf %2, %4 : vector<8x128xf32>
    %6 = math.tanh %5 : vector<8x128xf32>
    %7 = arith.truncf %6 : vector<8x128xf32> to vector<8x128xbf16>
    %c0_5 = arith.constant 0 : index
    %c0_6 = arith.constant 0 : index
    %8 = vector.load %arg4[%c0_5, %c0_6] : memref<128x128xbf16, #tpu.memory_space<vmem>>, vector<128x128xbf16>
    %cst_7 = arith.constant dense<0.000000e+00> : vector<8x128xf32>
    %9 = tpu.matmul %7, %8, %cst_7 {dimension_numbers = #tpu.dot_dimension_numbers<[1], [0], [0], [1], [0, 0, 1, 1], [], []>} : vector<8x128xbf16>, vector<128x128xbf16>, vector<8x128xf32> -> vector<8x128xf32>
    %c0_8 = arith.constant 0 : index
    %c0_9 = arith.constant 0 : index
    %10 = vector.load %arg5[%c0_8, %c0_9] : memref<1x128xf32, #tpu.memory_space<vmem>>, vector<1x128xf32>
    %11 = vector.broadcast %10 : vector<1x128xf32> to vector<8x128xf32>
    %12 = arith.addf %9, %11 : vector<8x128xf32>
    %13 = tpu.iota {dimensions = array<i32: 1>} : vector<8x128xi32>
    %c8_i32 = arith.constant 8 : i32
    %14 = vector.broadcast %c8_i32 : i32 to vector<8x128xi32>
    %15 = arith.cmpi sge, %13, %14 : vector<8x128xi32>
    %c11_i32 = arith.constant 11 : i32
    %16 = vector.broadcast %c11_i32 : i32 to vector<8x128xi32>
    %17 = arith.cmpi slt, %13, %16 : vector<8x128xi32>
    %18 = arith.andi %15, %17 : vector<8x128xi1>
    %19 = arith.negf %12 : vector<8x128xf32>
    %20 = math.exp %19 : vector<8x128xf32>
    %cst_10 = arith.constant 1.000000e+00 : f32
    %21 = vector.broadcast %cst_10 : f32 to vector<8x128xf32>
    %22 = arith.addf %21, %20 : vector<8x128xf32>
    %23 = arith.divf %21, %22 : vector<8x128xf32>
    %24 = arith.select %18, %23, %12 : vector<8x128xi1>, vector<8x128xf32>
    %c0_11 = arith.constant 0 : index
    %c0_12 = arith.constant 0 : index
    %25 = vector.load %arg6[%c0_11, %c0_12] : memref<8x128xf32, #tpu.memory_space<vmem>>, vector<8x128xf32>
    tpu.vector_store %arg6[%c0_11, %c0_12], %24 {strides = array<i32>} : memref<8x128xf32, #tpu.memory_space<vmem>>, vector<8x128xf32>,
    return
  }
  func.func @transform_0(%arg0: i32) -> (i32, i32) {
    %c0_i32 = arith.constant 0 : i32
    %c0_i32_0 = arith.constant 0 : i32
    return %arg0, %c0_i32 : i32, i32
  }
  func.func @transform_1(%arg0: i32) -> (i32, i32) {
    %c0_i32 = arith.constant 0 : i32
    %c0_i32_0 = arith.constant 0 : i32
    %c0_i32_1 = arith.constant 0 : i32
    return %c0_i32, %c0_i32_0 : i32, i32
  }
  func.func @transform_2(%arg0: i32) -> (i32, i32) {
    %c0_i32 = arith.constant 0 : i32
    %c0_i32_0 = arith.constant 0 : i32
    %c0_i32_1 = arith.constant 0 : i32
    return %c0_i32, %c0_i32_0 : i32, i32
  }
  func.func @transform_3(%arg0: i32) -> (i32, i32) {
    %c0_i32 = arith.constant 0 : i32
    %c0_i32_0 = arith.constant 0 : i32
    %c0_i32_1 = arith.constant 0 : i32
    return %c0_i32, %c0_i32_0 : i32, i32
  }
  func.func @transform_4(%arg0: i32) -> (i32, i32) {
    %c0_i32 = arith.constant 0 : i32
    %c0_i32_0 = arith.constant 0 : i32
    %c0_i32_1 = arith.constant 0 : i32
    return %c0_i32, %c0_i32_0 : i32, i32
  }
  func.func @transform_5(%arg0: i32) -> (i32, i32) {
    %c0_i32 = arith.constant 0 : i32
    %c0_i32_0 = arith.constant 0 : i32
    return %arg0, %c0_i32 : i32, i32
  }
}

module attributes {stable_mosaic.version = 11 : i64} {
  func.func @_head_kernel(%arg0: i32, %arg1: memref<8x128xbf16, #tpu.memory_space<vmem>>, %arg2: memref<128x128xbf16, #tpu.memory_space<vmem>>, %arg3: memref<1x128xf32, #tpu.memory_space<vmem>>, %arg4: memref<128x128xbf16, #tpu.memory_space<vmem>>, %arg5: memref<1x128xf32, #tpu.memory_space<vmem>>, %arg6: memref<8x128xf32, #tpu.memory_space<vmem>>) attributes {dimension_semantics = [#tpu.dimension_semantics<parallel>], iteration_bounds = array<i64: 1>, scalar_prefetch = 0 : i64, scratch_operands = 0 : i64, tpu.core_type = #tpu.core_type<tc>, window_params = [{transform_indices = @transform_0, window_bounds = array<i64: 8, 128>}, {pipeline_mode = #tpu.pipeline_mode<synchronous>, transform_indices = @transform_1, window_bounds = array<i64: 128, 128>}, {pipeline_mode = #tpu.pipeline_mode<synchronous>, transform_indices = @transform_2, window_bounds = array<i64: 1, 128>}, {pipeline_mode = #tpu.pipeline_mode<synchronous>, transform_indices = @transform_3, window_bounds = array<i64: 128, 128>}, {pipeline_mode = #tpu.pipeline_mode<synchronous>, transform_indices = @transform_4, window_bounds = array<i64: 1, 128>}, {transform_indices = @transform_5, window_bounds = array<i64: 8, 128>}]} {
    %c0 = arith.constant 0 : index
    %c0_0 = arith.constant 0 : index
    %0 = vector.load %arg1[%c0, %c0_0] : memref<8x128xbf16, #tpu.memory_space<vmem>>, vector<8x128xbf16>
    %c0_1 = arith.constant 0 : index
    %c0_2 = arith.constant 0 : index
    %1 = vector.load %arg2[%c0_1, %c0_2] : memref<128x128xbf16, #tpu.memory_space<vmem>>, vector<128x128xbf16>
    %cst = arith.constant dense<0.000000e+00> : vector<8x128xf32>
    %2 = tpu.matmul %0, %1, %cst {dimension_numbers = #tpu.dot_dimension_numbers<[1], [0], [0], [1], [0, 0, 1, 1], [], []>} : vector<8x128xbf16>, vector<128x128xbf16>, vector<8x128xf32> -> vector<8x128xf32>
    %c0_3 = arith.constant 0 : index
    %c0_4 = arith.constant 0 : index
    %3 = vector.load %arg3[%c0_3, %c0_4] : memref<1x128xf32, #tpu.memory_space<vmem>>, vector<1x128xf32>
    %4 = vector.broadcast %3 : vector<1x128xf32> to vector<8x128xf32>
    %5 = arith.addf %2, %4 : vector<8x128xf32>
    %6 = math.tanh %5 : vector<8x128xf32>
    %7 = arith.truncf %6 : vector<8x128xf32> to vector<8x128xbf16>
    %c0_5 = arith.constant 0 : index
    %c0_6 = arith.constant 0 : index
    %8 = vector.load %arg4[%c0_5, %c0_6] : memref<128x128xbf16, #tpu.memory_space<vmem>>, vector<128x128xbf16>
    %cst_7 = arith.constant dense<0.000000e+00> : vector<8x128xf32>
    %9 = tpu.matmul %7, %8, %cst_7 {dimension_numbers = #tpu.dot_dimension_numbers<[1], [0], [0], [1], [0, 0, 1, 1], [], []>} : vector<8x128xbf16>, vector<128x128xbf16>, vector<8x128xf32> -> vector<8x128xf32>
    %c0_8 = arith.constant 0 : index
    %c0_9 = arith.constant 0 : index
    %10 = vector.load %arg5[%c0_8, %c0_9] : memref<1x128xf32, #tpu.memory_space<vmem>>, vector<1x128xf32>
    %11 = vector.broadcast %10 : vector<1x128xf32> to vector<8x128xf32>
    %12 = arith.addf %9, %11 : vector<8x128xf32>
    %13 = tpu.iota {dimensions = array<i32: 1>} : vector<8x128xi32>
    %c8_i32 = arith.constant 8 : i32
    %14 = vector.broadcast %c8_i32 : i32 to vector<8x128xi32>
    %15 = arith.cmpi sge, %13, %14 : vector<8x128xi32>
    %c11_i32 = arith.constant 11 : i32
    %16 = vector.broadcast %c11_i32 : i32 to vector<8x128xi32>
    %17 = arith.cmpi slt, %13, %16 : vector<8x128xi32>
    %18 = arith.andi %15, %17 : vector<8x128xi1>
    %19 = arith.negf %12 : vector<8x128xf32>
    %20 = math.exp %19 : vector<8x128xf32>
    %cst_10 = arith.constant 1.000000e+00 : f32
    %21 = vector.broadcast %cst_10 : f32 to vector<8x128xf32>
    %22 = arith.addf %21, %20 : vector<8x128xf32>
    %23 = arith.divf %21, %22 : vector<8x128xf32>
    %24 = arith.select %18, %23, %12 : vector<8x128xi1>, vector<8x128xf32>
    %c0_11 = arith.constant 0 : index
    %c0_12 = arith.constant 0 : index
    %25 = vector.load %arg6[%c0_11, %c0_12] : memref<8x128xf32, #tpu.memory_space<vmem>>, vector<8x128xf32>
    tpu.vector_store %arg6[%c0_11, %c0_12], %24 {strides = array<i32>} : memref<8x128xf32, #tpu.memory_space<vmem>>, vector<8x128xf32>,
    return
  }
  func.func @transform_0(%arg0: i32) -> (i32, i32) {
    %c0_i32 = arith.constant 0 : i32
    %c0_i32_0 = arith.constant 0 : i32
    return %arg0, %c0_i32 : i32, i32
  }
  func.func @transform_1(%arg0: i32) -> (i32, i32) {
    %c0_i32 = arith.constant 0 : i32
    %c0_i32_0 = arith.constant 0 : i32
    %c0_i32_1 = arith.constant 0 : i32
    return %c0_i32, %c0_i32_0 : i32, i32
  }
  func.func @transform_2(%arg0: i32) -> (i32, i32) {
    %c0_i32 = arith.constant 0 : i32
    %c0_i32_0 = arith.constant 0 : i32
    %c0_i32_1 = arith.constant 0 : i32
    return %c0_i32, %c0_i32_0 : i32, i32
  }
  func.func @transform_3(%arg0: i32) -> (i32, i32) {
    %c0_i32 = arith.constant 0 : i32
    %c0_i32_0 = arith.constant 0 : i32
    %c0_i32_1 = arith.constant 0 : i32
    return %c0_i32, %c0_i32_0 : i32, i32
  }
  func.func @transform_4(%arg0: i32) -> (i32, i32) {
    %c0_i32 = arith.constant 0 : i32
    %c0_i32_0 = arith.constant 0 : i32
    %c0_i32_1 = arith.constant 0 : i32
    return %c0_i32, %c0_i32_0 : i32, i32
  }
  func.func @transform_5(%arg0: i32) -> (i32, i32) {
    %c0_i32 = arith.constant 0 : i32
    %c0_i32_0 = arith.constant 0 : i32
    return %arg0, %c0_i32 : i32, i32
  }
}

</mosaic_0001>

<bundles_post_ra>
// kernel: tpu_custom_call.1
= control target key start
LH: loop header
LB: loop body
LE: loop exit
PB: predicated region body
PF: predicated region fallthrough
CT: control target
= control target key end

     0   :  { %10 = vsyncpa [#allocation3], 0  ;;  %s614_s0 = inlined_call_operand.hbm [shape: bf16[8,128], index: 0, kind: input, shape index: {}]   ;;  %s615_s1 = inlined_call_operand.hbm [shape: bf16[128,128], index: 1, kind: input, shape index: {}]   ;;  %s616_s2 = inlined_call_operand.vmem [shape: f32[1,128], index: 2, kind: input, shape index: {}]   ;;  %s617_s3 = inlined_call_operand.hbm [shape: bf16[128,128], index: 3, kind: input, shape index: {}]   ;;  %s618_s4 = inlined_call_operand.vmem [shape: f32[1,128], index: 4, kind: input, shape index: {}]   ;;  %s619_s5 = inlined_call_operand.hbm [shape: f32[8,128], index: 5, kind: output, shape index: {}]  }
   0x1   :  { %11 = vsyncpa [#allocation6], 0 }
   0x2   :  { %12 = vsyncpa [#allocation4], 0  ;;  %s516_s18 = smov [#allocation5]   ;;  %s422_s22 = scalar_lea.hbm %s615_s1, 1024 }
   0x3   :  { %s28_s19 = sshll.u32 %s516_s18, 4  ;;  %p423_p0 = scmp.ne.s32.totalorder %s615_s1, %s422_s22  ;;  %s29_s19 = int_to_ptr.vmem [resolvable:$true] %s28_s19 }
   0x4   :  { %p426_p1 = scmp.lt.u32.totalorder %s422_s22, %s615_s1 }
   0x6   :  { %p428_p2 = pnand %p426_p1, %p423_p0 }
   0x8   :  { %431 = shalt.err (!%p428_p2)
}
   0x9   :  { %s432_s27 = scalar_lea.vmem %s29_s19, 1024  ;;  %p437_p4 = scmp.lt.s32.totalorder %s29_s19, %s29_s19 }
   0xa   :  { %p433_p3 = scmp.ne.s32.totalorder %s29_s19, %s432_s27  ;;  %p438_p5 = scmp.lt.s32.totalorder %s432_s27, %s432_s27 }
   0xc   :  { %p439_p6 = por %p438_p5, %p437_p4 }
   0xe   :  { %p440_p7 = pnand %p439_p6, %p433_p3 }
  0x10   :  { %443 = shalt.err (!%p440_p7)
}
  0x11   :  { %s517_s28 = smov 64   ;;  %s518_s29 = smov 4  }
  0x12   :  { %34 = dma.hbm_to_vmem [thread:$0]  %s615_s1, 1024, %s29_s19, [#allocation6], %s517_s28, %s517_s28, %s518_s29  }
  0x13   :  { %s519_s7 = smov [#allocation2]   ;;  %s520_s9 = smov [#allocation7]  }
  0x14   :  { %s19_s8 = sshll.u32 %s519_s7, 4  ;;  %s42_s10 = sshll.u32 %s520_s9, 4  ;;  %s20_s8 = int_to_ptr.vmem [resolvable:$true] %s19_s8  ;;  %s43_s10 = int_to_ptr.vmem [resolvable:$true] %s42_s10 }
  0x15   :  { %s444_s13 = scalar_lea.hbm %s614_s0, 64 }
  0x16   :  { %p445_p8 = scmp.ne.s32.totalorder %s614_s0, %s444_s13  ;;  %p448_p9 = scmp.lt.u32.totalorder %s444_s13, %s614_s0 }
  0x18   :  { %p450_p10 = pnand %p448_p9, %p445_p8 }
  0x1a   :  { %453 = shalt.err (!%p450_p10)
}
  0x1b   :  { %s454_s1 = scalar_lea.vmem %s20_s8, 64  ;;  %p459_p12 = scmp.lt.s32.totalorder %s20_s8, %s20_s8 }
  0x1c   :  { %p455_p11 = scmp.ne.s32.totalorder %s20_s8, %s454_s1  ;;  %p460_p13 = scmp.lt.s32.totalorder %s454_s1, %s454_s1 }
  0x1e   :  { %p461_p0 = por %p460_p13, %p459_p12 }
  0x20   :  { %p462_p1 = pnand %p461_p0, %p455_p11 }
  0x22   :  { %465 = shalt.err (!%p462_p1)
}
  0x23   :  { %22 = dma.hbm_to_vmem [thread:$0]  %s614_s0, 64, %s20_s8, [#allocation3]  }
  0x24   :  { %s466_s22 = scalar_lea.hbm %s617_s3, 1024 }
  0x25   :  { %p467_p2 = scmp.ne.s32.totalorder %s617_s3, %s466_s22  ;;  %p470_p3 = scmp.lt.u32.totalorder %s466_s22, %s617_s3 }
  0x27   :  { %p472_p4 = pnand %p470_p3, %p467_p2 }
  0x29   :  { %475 = shalt.err (!%p472_p4)
}
  0x2a   :  { %s476_s27 = scalar_lea.vmem %s43_s10, 1024  ;;  %p481_p6 = scmp.lt.s32.totalorder %s43_s10, %s43_s10 }
  0x2b   :  { %p477_p5 = scmp.ne.s32.totalorder %s43_s10, %s476_s27  ;;  %p482_p7 = scmp.lt.s32.totalorder %s476_s27, %s476_s27 }
  0x2d   :  { %p483_p8 = por %p482_p7, %p481_p6 }
  0x2f   :  { %p484_p9 = pnand %p483_p8, %p477_p5 }
  0x31   :  { %487 = shalt.err (!%p484_p9)
}
  0x32   :  { %48 = dma.hbm_to_vmem [thread:$0]  %s617_s3, 1024, %s43_s10, [#allocation6], %s517_s28, %s517_s28, %s518_s29  }
  0x33   :  { %510 = dma.done.wait [#allocation3], 64  }
  0x34   :  { %511 = vsyncadd [#allocation3], 4294967232 }
  0x35   :  { %512 = dma.done.wait [#allocation6], 2048  }
  0x36   :  { %513 = vsyncadd [#allocation6], 4294965248  ;;  %v521_v0 = vmov 0.0   ;;  %vm522_vm0 = vmmov 0   ;;  %v400_v1 = vld [vmem:[#allocation5] sm:$0xff]   ;;  %v401_v2 = vld [vmem:[#allocation5 + $0x8] sm:$0xff]   ;;  %v286_v34 = vlaneseq }
  0x37   :  { %352 = vmatprep.subr.bf16.mxu0 %v521_v0  ;;  %368 = vmatprep.mubr.msk.bf16.mxu0 %vm522_vm0, %v521_v0  ;;  %v402_v3 = vld [vmem:[#allocation5 + $0x10] sm:$0xff]   ;;  %v408_v4 = vld [vmem:[#allocation7] sm:$0xff]   ;;  %v403_v5 = vld [vmem:[#allocation5 + $0x18] sm:$0xff]  }
  0x38   :  { %372 = vmatprep.subr.bf16.mxu1 %v521_v0  ;;  %388 = vmatprep.mubr.msk.bf16.mxu1 %vm522_vm0, %v521_v0  ;;  %v409_v6 = vld [vmem:[#allocation7 + $0x8] sm:$0xff]   ;;  %v404_v7 = vld [vmem:[#allocation5 + $0x20] sm:$0xff]   ;;  %v410_v8 = vld [vmem:[#allocation7 + $0x10] sm:$0xff]   ;;  %v287_v36 = vand.u32 127, %v286_v34 }
  0x39   :  { %353 = vmatpush3.bf16.msra.mxu0 %v400_v1  ;;  %373 = vmatpush3.bf16.msra.mxu1 %v408_v4  ;;  %v405_v9 = vld [vmem:[#allocation5 + $0x28] sm:$0xff]   ;;  %v411_v10 = vld [vmem:[#allocation7 + $0x18] sm:$0xff]   ;;  %v406_v11 = vld [vmem:[#allocation5 + $0x30] sm:$0xff]  }
  0x3a   :  { %354 = vmatprep.subr.bf16.mxu0 %v521_v0  ;;  %374 = vmatprep.subr.bf16.mxu1 %v521_v0  ;;  %v407_v12 = vld [vmem:[#allocation5 + $0x38] sm:$0xff]   ;;  %v412_v14 = vld [vmem:[#allocation7 + $0x20] sm:$0xff]   ;;  %v413_v15 = vld [vmem:[#allocation7 + $0x28] sm:$0xff]   ;;  %vm288_vm1 = vcmp.ge.s32.totalorder %v287_v36, 8  ;;  %vm289_vm2 = vcmp.lt.s32.totalorder %v287_v36, 11 }
  0x3b   :  { %v61_v13 = vld [vmem:[#allocation2] sm:$0xf]  ;;  %v414_v16 = vld [vmem:[#allocation7 + $0x30] sm:$0xff]   ;;  %vm290_vm3 = vmand %vm288_vm1, %vm289_vm2 }
  0x3c   :  { %v415_v17 = vld [vmem:[#allocation7 + $0x38] sm:$0xff]  }
  0x3d   :  { %355 = vmatpush3.bf16.msra.mxu0 %v401_v2  ;;  %375 = vmatpush3.bf16.msra.mxu1 %v409_v6  ;;  %v315_v18 = vld [vmem:[%s616_s2] ss:$0 sm:$0xff]  ;;  %s523_s2 = smov [#allocation8]  }
  0x3e   :  { %356 = vmatprep.subr.bf16.mxu0 %v521_v0  ;;  %376 = vmatprep.subr.bf16.mxu1 %v521_v0  ;;  %v324_v26 = vld [vmem:[%s618_s4] ss:$0 sm:$0xff]  ;;  %s305_s7 = sshll.u32 %s523_s2, 4  ;;  %s306_s7 = int_to_ptr.vmem [resolvable:$true] %s305_s7 }
  0x3f   :  { %s488_s4 = scalar_lea.vmem %s306_s7, 128  ;;  %p493_p11 = scmp.lt.s32.totalorder %s306_s7, %s306_s7 }
  0x40   :  { %p489_p10 = scmp.ne.s32.totalorder %s306_s7, %s488_s4  ;;  %p494_p12 = scmp.lt.s32.totalorder %s488_s4, %s488_s4 }
  0x41   :  { %357 = vmatpush3.bf16.msra.mxu0 %v402_v3  ;;  %377 = vmatpush3.bf16.msra.mxu1 %v410_v8 }
  0x42   :  { %358 = vmatprep.subr.bf16.mxu0 %v521_v0  ;;  %378 = vmatprep.subr.bf16.mxu1 %v521_v0  ;;  %p495_p13 = por %p494_p12, %p493_p11 }
  0x44   :  { %p496_p0 = pnand %p495_p13, %p489_p10 }
  0x45   :  { %359 = vmatpush3.bf16.msra.mxu0 %v403_v5  ;;  %379 = vmatpush3.bf16.msra.mxu1 %v411_v10 }
  0x46   :  { %360 = vmatprep.subr.bf16.mxu0 %v521_v0  ;;  %380 = vmatprep.subr.bf16.mxu1 %v521_v0 }
  0x49   :  { %361 = vmatpush3.bf16.msra.mxu0 %v404_v7  ;;  %381 = vmatpush3.bf16.msra.mxu1 %v412_v14 }
  0x4a   :  { %362 = vmatprep.subr.bf16.mxu0 %v521_v0  ;;  %382 = vmatprep.subr.bf16.mxu1 %v521_v0 }
  0x4d   :  { %363 = vmatpush3.bf16.msra.mxu0 %v405_v9  ;;  %383 = vmatpush3.bf16.msra.mxu1 %v413_v15 }
  0x4e   :  { %364 = vmatprep.subr.bf16.mxu0 %v521_v0  ;;  %384 = vmatprep.subr.bf16.mxu1 %v521_v0 }
  0x51   :  { %365 = vmatpush3.bf16.msra.mxu0 %v406_v11  ;;  %385 = vmatpush3.bf16.msra.mxu1 %v414_v16 }
  0x52   :  { %366 = vmatprep.subr.bf16.mxu0 %v521_v0  ;;  %386 = vmatprep.subr.bf16.mxu1 %v521_v0 }
  0x55   :  { %367 = vmatpush3.bf16.msra.mxu0 %v407_v12  ;;  %387 = vmatpush3.bf16.msra.mxu1 %v415_v17 }
  0x58   :  { %369 = vmatmul.mubr.bf16.vlgmr.msra.gmra.mrb[0].mxu0 %v61_v13 }
 0x12b   :  { %v167_v19 = vpop.f32.mrb[0].mxu0 }
 0x12c   :  { %v168_v20 = vadd.f32 %v315_v18, %v167_v19  ;;  %v370_v21 = vpop.f32.mrb[1].mxu0 }
 0x12d   :  { %v170_v22 = vpop.f32.mrb[2].mxu0 }
 0x12e   :  { %416 = vtanh.f32 %v168_v20  ;;  %v371_v23 = vpop.f32.mrb[3].mxu0 }
 0x138   :  { %v417_v24 = vpop.eup %416 }
 0x139   :  { %v174_v25 = vpack.c.bf16 %v417_v24, %v417_v24 }
 0x13b   :  { %389 = vmatmul.mubr.bf16.vlgmr.msra.gmra.mrb[0].mxu1 %v174_v25 }
 0x20e   :  { %v280_v27 = vpop.f32.mrb[0].mxu1 }
 0x20f   :  { %v281_v28 = vadd.f32 %v324_v26, %v280_v27  ;;  %v390_v29 = vpop.f32.mrb[1].mxu1 }
 0x210   :  { %v283_v30 = vpop.f32.mrb[2].mxu1 }
 0x211   :  { %v333_v31 = vmul.f32 -1.442695, %v281_v28  ;;  %v391_v32 = vpop.f32.mrb[3].mxu1 }
 0x213   :  { %418 = vpow2.f32 %v333_v31 }
 0x21d   :  { %v419_v33 = vpop.eup %418 }
 0x21e   :  { %v294_v35 = vadd.f32 1.0, %v419_v33 }
 0x220   :  { %420 = vrcp.f32 %v294_v35 }
 0x22a   :  { %v421_v37 = vpop.eup %420 }
 0x22b   :  { %v297_v38 = vsel %vm290_vm3, %v421_v37, %v281_v28 }
 0x22c   :  { %298 = vst [vmem:[#allocation8] sm:$0xff] %v297_v38 }
 0x22d   :  { %499 = shalt.err (!%p496_p0)
}
 0x22e   :  { %s500_s10 = scalar_lea.hbm %s619_s5, 128 }
 0x22f   :  { %p501_p1 = scmp.ne.s32.totalorder %s619_s5, %s500_s10  ;;  %p504_p2 = scmp.lt.u32.totalorder %s500_s10, %s619_s5 }
 0x231   :  { %p506_p3 = pnand %p504_p2, %p501_p1 }
 0x233   :  { %509 = shalt.err (!%p506_p3)
}
 0x234   :  { %308 = dma.vmem_to_hbm [thread:$0]  %s306_s7, 128, %s619_s5, [#allocation4]  }
 0x235   :  { %514 = dma.done.wait [#allocation4], 128  }
 0x236   :  { %515 = vsyncadd [#allocation4], 4294967168 }
 0x237   :  { %312 = vsyncpa [#allocation3], 1 }
 0x238   :  { %313 = vsyncpa [#allocation6], 1 }
 0x239   :  { %314 = vsyncpa [#allocation4], 1 }

// kernel: tpu_custom_call.1
= control target key start
LH: loop header
LB: loop body
LE: loop exit
PB: predicated region body
PF: predicated region fallthrough
CT: control target
= control target key end

     0   :  { %10 = vsyncpa [#allocation3], 0  ;;  %s614_s0 = inlined_call_operand.hbm [shape: bf16[8,128], index: 0, kind: input, shape index: {}]   ;;  %s615_s1 = inlined_call_operand.hbm [shape: bf16[128,128], index: 1, kind: input, shape index: {}]   ;;  %s616_s2 = inlined_call_operand.vmem [shape: f32[1,128], index: 2, kind: input, shape index: {}]   ;;  %s617_s3 = inlined_call_operand.hbm [shape: bf16[128,128], index: 3, kind: input, shape index: {}]   ;;  %s618_s4 = inlined_call_operand.vmem [shape: f32[1,128], index: 4, kind: input, shape index: {}]   ;;  %s619_s5 = inlined_call_operand.hbm [shape: f32[8,128], index: 5, kind: output, shape index: {}]  }
   0x1   :  { %11 = vsyncpa [#allocation6], 0 }
   0x2   :  { %12 = vsyncpa [#allocation4], 0  ;;  %s516_s18 = smov [#allocation5]   ;;  %s422_s22 = scalar_lea.hbm %s615_s1, 1024 }
   0x3   :  { %s28_s19 = sshll.u32 %s516_s18, 4  ;;  %p423_p0 = scmp.ne.s32.totalorder %s615_s1, %s422_s22  ;;  %s29_s19 = int_to_ptr.vmem [resolvable:$true] %s28_s19 }
   0x4   :  { %p426_p1 = scmp.lt.u32.totalorder %s422_s22, %s615_s1 }
   0x6   :  { %p428_p2 = pnand %p426_p1, %p423_p0 }
   0x8   :  { %431 = shalt.err (!%p428_p2)
}
   0x9   :  { %s432_s27 = scalar_lea.vmem %s29_s19, 1024  ;;  %p437_p4 = scmp.lt.s32.totalorder %s29_s19, %s29_s19 }
   0xa   :  { %p433_p3 = scmp.ne.s32.totalorder %s29_s19, %s432_s27  ;;  %p438_p5 = scmp.lt.s32.totalorder %s432_s27, %s432_s27 }
   0xc   :  { %p439_p6 = por %p438_p5, %p437_p4 }
   0xe   :  { %p440_p7 = pnand %p439_p6, %p433_p3 }
  0x10   :  { %443 = shalt.err (!%p440_p7)
}
  0x11   :  { %s517_s28 = smov 64   ;;  %s518_s29 = smov 4  }
  0x12   :  { %34 = dma.hbm_to_vmem [thread:$0]  %s615_s1, 1024, %s29_s19, [#allocation6], %s517_s28, %s517_s28, %s518_s29  }
  0x13   :  { %s519_s7 = smov [#allocation2]   ;;  %s520_s9 = smov [#allocation7]  }
  0x14   :  { %s19_s8 = sshll.u32 %s519_s7, 4  ;;  %s42_s10 = sshll.u32 %s520_s9, 4  ;;  %s20_s8 = int_to_ptr.vmem [resolvable:$true] %s19_s8  ;;  %s43_s10 = int_to_ptr.vmem [resolvable:$true] %s42_s10 }
  0x15   :  { %s444_s13 = scalar_lea.hbm %s614_s0, 64 }
  0x16   :  { %p445_p8 = scmp.ne.s32.totalorder %s614_s0, %s444_s13  ;;  %p448_p9 = scmp.lt.u32.totalorder %s444_s13, %s614_s0 }
  0x18   :  { %p450_p10 = pnand %p448_p9, %p445_p8 }
  0x1a   :  { %453 = shalt.err (!%p450_p10)
}
  0x1b   :  { %s454_s1 = scalar_lea.vmem %s20_s8, 64  ;;  %p459_p12 = scmp.lt.s32.totalorder %s20_s8, %s20_s8 }
  0x1c   :  { %p455_p11 = scmp.ne.s32.totalorder %s20_s8, %s454_s1  ;;  %p460_p13 = scmp.lt.s32.totalorder %s454_s1, %s454_s1 }
  0x1e   :  { %p461_p0 = por %p460_p13, %p459_p12 }
  0x20   :  { %p462_p1 = pnand %p461_p0, %p455_p11 }
  0x22   :  { %465 = shalt.err (!%p462_p1)
}
  0x23   :  { %22 = dma.hbm_to_vmem [thread:$0]  %s614_s0, 64, %s20_s8, [#allocation3]  }
  0x24   :  { %s466_s22 = scalar_lea.hbm %s617_s3, 1024 }
  0x25   :  { %p467_p2 = scmp.ne.s32.totalorder %s617_s3, %s466_s22  ;;  %p470_p3 = scmp.lt.u32.totalorder %s466_s22, %s617_s3 }
  0x27   :  { %p472_p4 = pnand %p470_p3, %p467_p2 }
  0x29   :  { %475 = shalt.err (!%p472_p4)
}
  0x2a   :  { %s476_s27 = scalar_lea.vmem %s43_s10, 1024  ;;  %p481_p6 = scmp.lt.s32.totalorder %s43_s10, %s43_s10 }
  0x2b   :  { %p477_p5 = scmp.ne.s32.totalorder %s43_s10, %s476_s27  ;;  %p482_p7 = scmp.lt.s32.totalorder %s476_s27, %s476_s27 }
  0x2d   :  { %p483_p8 = por %p482_p7, %p481_p6 }
  0x2f   :  { %p484_p9 = pnand %p483_p8, %p477_p5 }
  0x31   :  { %487 = shalt.err (!%p484_p9)
}
  0x32   :  { %48 = dma.hbm_to_vmem [thread:$0]  %s617_s3, 1024, %s43_s10, [#allocation6], %s517_s28, %s517_s28, %s518_s29  }
  0x33   :  { %510 = dma.done.wait [#allocation3], 64  }
  0x34   :  { %511 = vsyncadd [#allocation3], 4294967232 }
  0x35   :  { %512 = dma.done.wait [#allocation6], 2048  }
  0x36   :  { %513 = vsyncadd [#allocation6], 4294965248  ;;  %v521_v0 = vmov 0.0   ;;  %vm522_vm0 = vmmov 0   ;;  %v400_v1 = vld [vmem:[#allocation5] sm:$0xff]   ;;  %v401_v2 = vld [vmem:[#allocation5 + $0x8] sm:$0xff]   ;;  %v286_v34 = vlaneseq }
  0x37   :  { %352 = vmatprep.subr.bf16.mxu0 %v521_v0  ;;  %368 = vmatprep.mubr.msk.bf16.mxu0 %vm522_vm0, %v521_v0  ;;  %v402_v3 = vld [vmem:[#allocation5 + $0x10] sm:$0xff]   ;;  %v408_v4 = vld [vmem:[#allocation7] sm:$0xff]   ;;  %v403_v5 = vld [vmem:[#allocation5 + $0x18] sm:$0xff]  }
  0x38   :  { %372 = vmatprep.subr.bf16.mxu1 %v521_v0  ;;  %388 = vmatprep.mubr.msk.bf16.mxu1 %vm522_vm0, %v521_v0  ;;  %v409_v6 = vld [vmem:[#allocation7 + $0x8] sm:$0xff]   ;;  %v404_v7 = vld [vmem:[#allocation5 + $0x20] sm:$0xff]   ;;  %v410_v8 = vld [vmem:[#allocation7 + $0x10] sm:$0xff]   ;;  %v287_v36 = vand.u32 127, %v286_v34 }
  0x39   :  { %353 = vmatpush3.bf16.msra.mxu0 %v400_v1  ;;  %373 = vmatpush3.bf16.msra.mxu1 %v408_v4  ;;  %v405_v9 = vld [vmem:[#allocation5 + $0x28] sm:$0xff]   ;;  %v411_v10 = vld [vmem:[#allocation7 + $0x18] sm:$0xff]   ;;  %v406_v11 = vld [vmem:[#allocation5 + $0x30] sm:$0xff]  }
  0x3a   :  { %354 = vmatprep.subr.bf16.mxu0 %v521_v0  ;;  %374 = vmatprep.subr.bf16.mxu1 %v521_v0  ;;  %v407_v12 = vld [vmem:[#allocation5 + $0x38] sm:$0xff]   ;;  %v412_v14 = vld [vmem:[#allocation7 + $0x20] sm:$0xff]   ;;  %v413_v15 = vld [vmem:[#allocation7 + $0x28] sm:$0xff]   ;;  %vm288_vm1 = vcmp.ge.s32.totalorder %v287_v36, 8  ;;  %vm289_vm2 = vcmp.lt.s32.totalorder %v287_v36, 11 }
  0x3b   :  { %v61_v13 = vld [vmem:[#allocation2] sm:$0xf]  ;;  %v414_v16 = vld [vmem:[#allocation7 + $0x30] sm:$0xff]   ;;  %vm290_vm3 = vmand %vm288_vm1, %vm289_vm2 }
  0x3c   :  { %v415_v17 = vld [vmem:[#allocation7 + $0x38] sm:$0xff]  }
  0x3d   :  { %355 = vmatpush3.bf16.msra.mxu0 %v401_v2  ;;  %375 = vmatpush3.bf16.msra.mxu1 %v409_v6  ;;  %v315_v18 = vld [vmem:[%s616_s2] ss:$0 sm:$0xff]  ;;  %s523_s2 = smov [#allocation8]  }
  0x3e   :  { %356 = vmatprep.subr.bf16.mxu0 %v521_v0  ;;  %376 = vmatprep.subr.bf16.mxu1 %v521_v0  ;;  %v324_v26 = vld [vmem:[%s618_s4] ss:$0 sm:$0xff]  ;;  %s305_s7 = sshll.u32 %s523_s2, 4  ;;  %s306_s7 = int_to_ptr.vmem [resolvable:$true] %s305_s7 }
  0x3f   :  { %s488_s4 = scalar_lea.vmem %s306_s7, 128  ;;  %p493_p11 = scmp.lt.s32.totalorder %s306_s7, %s306_s7 }
  0x40   :  { %p489_p10 = scmp.ne.s32.totalorder %s306_s7, %s488_s4  ;;  %p494_p12 = scmp.lt.s32.totalorder %s488_s4, %s488_s4 }
  0x41   :  { %357 = vmatpush3.bf16.msra.mxu0 %v402_v3  ;;  %377 = vmatpush3.bf16.msra.mxu1 %v410_v8 }
  0x42   :  { %358 = vmatprep.subr.bf16.mxu0 %v521_v0  ;;  %378 = vmatprep.subr.bf16.mxu1 %v521_v0  ;;  %p495_p13 = por %p494_p12, %p493_p11 }
  0x44   :  { %p496_p0 = pnand %p495_p13, %p489_p10 }
  0x45   :  { %359 = vmatpush3.bf16.msra.mxu0 %v403_v5  ;;  %379 = vmatpush3.bf16.msra.mxu1 %v411_v10 }
  0x46   :  { %360 = vmatprep.subr.bf16.mxu0 %v521_v0  ;;  %380 = vmatprep.subr.bf16.mxu1 %v521_v0 }
  0x49   :  { %361 = vmatpush3.bf16.msra.mxu0 %v404_v7  ;;  %381 = vmatpush3.bf16.msra.mxu1 %v412_v14 }
  0x4a   :  { %362 = vmatprep.subr.bf16.mxu0 %v521_v0  ;;  %382 = vmatprep.subr.bf16.mxu1 %v521_v0 }
  0x4d   :  { %363 = vmatpush3.bf16.msra.mxu0 %v405_v9  ;;  %383 = vmatpush3.bf16.msra.mxu1 %v413_v15 }
  0x4e   :  { %364 = vmatprep.subr.bf16.mxu0 %v521_v0  ;;  %384 = vmatprep.subr.bf16.mxu1 %v521_v0 }
  0x51   :  { %365 = vmatpush3.bf16.msra.mxu0 %v406_v11  ;;  %385 = vmatpush3.bf16.msra.mxu1 %v414_v16 }
  0x52   :  { %366 = vmatprep.subr.bf16.mxu0 %v521_v0  ;;  %386 = vmatprep.subr.bf16.mxu1 %v521_v0 }
  0x55   :  { %367 = vmatpush3.bf16.msra.mxu0 %v407_v12  ;;  %387 = vmatpush3.bf16.msra.mxu1 %v415_v17 }
  0x58   :  { %369 = vmatmul.mubr.bf16.vlgmr.msra.gmra.mrb[0].mxu0 %v61_v13 }
 0x12b   :  { %v167_v19 = vpop.f32.mrb[0].mxu0 }
 0x12c   :  { %v168_v20 = vadd.f32 %v315_v18, %v167_v19  ;;  %v370_v21 = vpop.f32.mrb[1].mxu0 }
 0x12d   :  { %v170_v22 = vpop.f32.mrb[2].mxu0 }
 0x12e   :  { %416 = vtanh.f32 %v168_v20  ;;  %v371_v23 = vpop.f32.mrb[3].mxu0 }
 0x138   :  { %v417_v24 = vpop.eup %416 }
 0x139   :  { %v174_v25 = vpack.c.bf16 %v417_v24, %v417_v24 }
 0x13b   :  { %389 = vmatmul.mubr.bf16.vlgmr.msra.gmra.mrb[0].mxu1 %v174_v25 }
 0x20e   :  { %v280_v27 = vpop.f32.mrb[0].mxu1 }
 0x20f   :  { %v281_v28 = vadd.f32 %v324_v26, %v280_v27  ;;  %v390_v29 = vpop.f32.mrb[1].mxu1 }
 0x210   :  { %v283_v30 = vpop.f32.mrb[2].mxu1 }
 0x211   :  { %v333_v31 = vmul.f32 -1.442695, %v281_v28  ;;  %v391_v32 = vpop.f32.mrb[3].mxu1 }
 0x213   :  { %418 = vpow2.f32 %v333_v31 }
 0x21d   :  { %v419_v33 = vpop.eup %418 }
 0x21e   :  { %v294_v35 = vadd.f32 1.0, %v419_v33 }
 0x220   :  { %420 = vrcp.f32 %v294_v35 }
 0x22a   :  { %v421_v37 = vpop.eup %420 }
 0x22b   :  { %v297_v38 = vsel %vm290_vm3, %v421_v37, %v281_v28 }
 0x22c   :  { %298 = vst [vmem:[#allocation8] sm:$0xff] %v297_v38 }
 0x22d   :  { %499 = shalt.err (!%p496_p0)
}
 0x22e   :  { %s500_s10 = scalar_lea.hbm %s619_s5, 128 }
 0x22f   :  { %p501_p1 = scmp.ne.s32.totalorder %s619_s5, %s500_s10  ;;  %p504_p2 = scmp.lt.u32.totalorder %s500_s10, %s619_s5 }
 0x231   :  { %p506_p3 = pnand %p504_p2, %p501_p1 }
 0x233   :  { %509 = shalt.err (!%p506_p3)
}
 0x234   :  { %308 = dma.vmem_to_hbm [thread:$0]  %s306_s7, 128, %s619_s5, [#allocation4]  }
 0x235   :  { %514 = dma.done.wait [#allocation4], 128  }
 0x236   :  { %515 = vsyncadd [#allocation4], 4294967168 }
 0x237   :  { %312 = vsyncpa [#allocation3], 1 }
 0x238   :  { %313 = vsyncpa [#allocation6], 1 }
 0x239   :  { %314 = vsyncpa [#allocation4], 1 }

</bundles_post_ra>
